<compile_context>
chip_gen: v5e
topology: v5e:2x2
jax: 0.10.0
libtpu: 0.0.40
codegen_flags: <defaults>
</compile_context>

<pallas_src>
import functools

import jax
import jax.numpy as jnp
from jax.experimental import pallas as pl
from jax.experimental.pallas import tpu as pltpu


def _mha_kernel(xq_ref, xkv_ref,
                wq_ref, wk_ref, wv_ref,
                bq_ref, bk_ref, bv_ref,
                wo_ref, bo_ref,
                o_ref, *, num_heads, head_dim):
    f32 = jnp.float32
    bf16 = jnp.bfloat16

    xq = xq_ref[0]                        # (TQ, C) f32 — q rows + residual
    xq_b = xq.astype(bf16)
    xkv_b = xkv_ref[0].astype(bf16)       # (N, C) bf16 — full sequence for K/V

    # Fused (self.qkv branch ∘ MHA in-proj) projections; softmax scale is
    # already folded into wq/bq in the wrapper.
    qp = jnp.dot(xq_b, wq_ref[...], preferred_element_type=f32) + bq_ref[...]   # (TQ, C)
    kp = jnp.dot(xkv_b, wk_ref[...], preferred_element_type=f32) + bk_ref[...]  # (N, C)
    vp = jnp.dot(xkv_b, wv_ref[...], preferred_element_type=f32) + bv_ref[...]  # (N, C)

    # Residual + out-projection bias seed the lane-dense (TQ, C) accumulator.
    out_acc = xq + bo_ref[...]

    # Static head loop; each head accumulates its out-projection contribution
    # directly into out_acc (no concatenate, no (TQ, C) attn intermediate).
    for h in range(num_heads):
        lo = h * head_dim
        hi = lo + head_dim
        qh = qp[:, lo:hi].astype(bf16)    # (TQ, D)   (scale pre-folded)
        kh = kp[:, lo:hi].astype(bf16)    # (N, D)
        vh = vp[:, lo:hi].astype(bf16)    # (N, D)

        s = jnp.dot(qh, kh.T, preferred_element_type=f32)      # (TQ, N) f32
        s = s - jnp.max(s, axis=-1, keepdims=True)
        p = jnp.exp(s)
        inv = pl.reciprocal(jnp.sum(p, axis=-1, keepdims=True), approx=True)

        # Deferred normalization: scale the (TQ, D) head output, not the scores.
        oh = jnp.dot(p.astype(bf16), vh, preferred_element_type=f32) * inv     # (TQ, D)

        out_acc = out_acc + jnp.dot(oh.astype(bf16), wo_ref[lo:hi, :],
                                    preferred_element_type=f32)                # (TQ, C)

    o_ref[0] = out_acc.astype(o_ref.dtype)


def vanilla_mha_forward(x, params, num_heads):
    B, N, C = x.shape
    assert C % num_heads == 0
    D = C // num_heads
    scale = 1.0 / (D ** 0.5)

    w_qkv = params["w_qkv"]             # (3C, C), torch Linear layout (out, in)
    b_qkv = params["b_qkv"]             # (3C,)
    in_w = params["in_proj_weight"]     # (3C, C)
    in_b = params["in_proj_bias"]       # (3C,)
    out_w = params["out_proj_weight"]   # (C, C)
    out_b = params["out_proj_bias"]     # (C,)

    # Fuse the two back-to-back linears per q/k/v branch (done once, offline):
    #   x @ W0 + b0 then @ Wi + bi   ==   x @ (W0 @ Wi) + (b0 @ Wi + bi)
    def fuse(i, fold_scale):
        w0 = w_qkv[i * C:(i + 1) * C].T        # (C, C)
        b0 = b_qkv[i * C:(i + 1) * C]          # (C,)
        wi = in_w[i * C:(i + 1) * C].T         # (C, C)
        bi = in_b[i * C:(i + 1) * C]           # (C,)
        w = w0 @ wi
        b = b0 @ wi + bi
        if fold_scale:                         # fold 1/sqrt(D) into q projection
            w = w * scale
            b = b * scale
        return w.astype(jnp.bfloat16), b.reshape(1, C).astype(jnp.float32)

    wq, bq = fuse(0, True)
    wk, bk = fuse(1, False)
    wv, bv = fuse(2, False)
    wo = out_w.T.astype(jnp.bfloat16)
    bo = out_b.reshape(1, C).astype(jnp.float32)

    # q-row tiling over the sequence (full tile if N <= 128).
    TQ = N if N <= 128 else 128
    assert N % TQ == 0, "sequence length must be a multiple of the q tile"

    kernel = functools.partial(_mha_kernel, num_heads=num_heads, head_dim=D)

    def const_spec(shape):
        return pl.BlockSpec(shape, lambda b, q: (0,) * len(shape))

    grid_spec = pltpu.PrefetchScalarGridSpec(
        num_scalar_prefetch=0,
        grid=(B, N // TQ),
        in_specs=[
            pl.BlockSpec((1, TQ, C), lambda b, q: (b, q, 0)),   # x: q-row tile
            pl.BlockSpec((1, N, C), lambda b, q: (b, 0, 0)),    # x: full seq for K/V
            const_spec((C, C)), const_spec((C, C)), const_spec((C, C)),   # wq wk wv
            const_spec((1, C)), const_spec((1, C)), const_spec((1, C)),   # bq bk bv
            const_spec((C, C)), const_spec((1, C)),                       # wo bo
        ],
        out_specs=pl.BlockSpec((1, TQ, C), lambda b, q: (b, q, 0)),
    )

    return pl.pallas_call(
        kernel,
        out_shape=jax.ShapeDtypeStruct((B, N, C), x.dtype),
        grid_spec=grid_spec,
        compiler_params=pltpu.CompilerParams(
            # Both axes independent -> shardable across TCs (v7x megacore).
            dimension_semantics=("parallel", "parallel"),
            # Explicit scoped-VMEM cap, safe on v5e/v6e (128 MiB) and v7x (64 MiB).
            vmem_limit_bytes=32 * 1024 * 1024,
        ),
    )(x, x, wq, wk, wv, bq, bk, bv, wo, bo)


def reference_forward(x, params, num_heads):
    """Plain-JAX f32 reference matching the PyTorch forward."""
    B, N, C = x.shape
    D = C // num_heads
    qkv = x @ params["w_qkv"].T + params["b_qkv"]
    q, k, v = qkv[..., :C], qkv[..., C:2 * C], qkv[..., 2 * C:]
    in_w, in_b = params["in_proj_weight"], params["in_proj_bias"]
    qp = q @ in_w[:C].T + in_b[:C]
    kp = k @ in_w[C:2 * C].T + in_b[C:2 * C]
    vp = v @ in_w[2 * C:].T + in_b[2 * C:]

    def split(t):
        return t.reshape(B, N, num_heads, D).transpose(0, 2, 1, 3)

    qh, kh, vh = split(qp), split(kp), split(vp)
    s = (qh @ kh.transpose(0, 1, 3, 2)) * (1.0 / (D ** 0.5))
    p = jax.nn.softmax(s, axis=-1)
    o = (p @ vh).transpose(0, 2, 1, 3).reshape(B, N, C)
    out = o @ params["out_proj_weight"].T + params["out_proj_bias"]
    return out + x


def make_params(key, dim):
    ks = jax.random.split(key, 6)
    scale = 0.05
    return {
        "w_qkv": scale * jax.random.normal(ks[0], (3 * dim, dim), jnp.float32),
        "b_qkv": scale * jax.random.normal(ks[1], (3 * dim,), jnp.float32),
        "in_proj_weight": scale * jax.random.normal(ks[2], (3 * dim, dim), jnp.float32),
        "in_proj_bias": scale * jax.random.normal(ks[3], (3 * dim,), jnp.float32),
        "out_proj_weight": scale * jax.random.normal(ks[4], (dim, dim), jnp.float32),
        "out_proj_bias": scale * jax.random.normal(ks[5], (dim,), jnp.float32),
    }


if __name__ == "__main__":
    B, N, C, H = 2, 8, 32, 4  # batch, seq, dim, num_heads  (head_dim = 8)

    key = jax.random.PRNGKey(0)
    kx, kp = jax.random.split(key)
    x = jax.random.normal(kx, (B, N, C), jnp.float32)
    params = make_params(kp, C)

    out = vanilla_mha_forward(x, params, num_heads=H)
    out = jax.block_until_ready(out)

    ref = reference_forward(x, params, num_heads=H)
    assert out.shape == (B, N, C)
    # bf16 MXU matmuls (f32 accumulation) + approx reciprocal => relaxed tolerance.
    assert jnp.allclose(out, ref, rtol=2e-2, atol=2e-2), "mismatch vs reference"

    print("KERNEL_OK")
</pallas_src>

<mosaic_0001>
module attributes {stable_mosaic.version = 11 : i64} {
  func.func @_mha_kernel(%arg0: i32, %arg1: i32, %arg2: memref<1x8x32xf32, #tpu.memory_space<vmem>>, %arg3: memref<1x8x32xf32, #tpu.memory_space<vmem>>, %arg4: memref<32x32xbf16, #tpu.memory_space<vmem>>, %arg5: memref<32x32xbf16, #tpu.memory_space<vmem>>, %arg6: memref<32x32xbf16, #tpu.memory_space<vmem>>, %arg7: memref<1x32xf32, #tpu.memory_space<vmem>>, %arg8: memref<1x32xf32, #tpu.memory_space<vmem>>, %arg9: memref<1x32xf32, #tpu.memory_space<vmem>>, %arg10: memref<32x32xbf16, #tpu.memory_space<vmem>>, %arg11: memref<1x32xf32, #tpu.memory_space<vmem>>, %arg12: memref<1x8x32xf32, #tpu.memory_space<vmem>>) attributes {dimension_semantics = [#tpu.dimension_semantics<parallel>, #tpu.dimension_semantics<parallel>], iteration_bounds = array<i64: 2, 1>, scalar_prefetch = 0 : i64, scratch_operands = 0 : i64, tpu.core_type = #tpu.core_type<tc>, window_params = [{transform_indices = @transform_0, window_bounds = array<i64: 1, 8, 32>}, {transform_indices = @transform_1, window_bounds = array<i64: 1, 8, 32>}, {pipeline_mode = #tpu.pipeline_mode<synchronous>, transform_indices = @transform_2, window_bounds = array<i64: 32, 32>}, {pipeline_mode = #tpu.pipeline_mode<synchronous>, transform_indices = @transform_3, window_bounds = array<i64: 32, 32>}, {pipeline_mode = #tpu.pipeline_mode<synchronous>, transform_indices = @transform_4, window_bounds = array<i64: 32, 32>}, {pipeline_mode = #tpu.pipeline_mode<synchronous>, transform_indices = @transform_5, window_bounds = array<i64: 1, 32>}, {pipeline_mode = #tpu.pipeline_mode<synchronous>, transform_indices = @transform_6, window_bounds = array<i64: 1, 32>}, {pipeline_mode = #tpu.pipeline_mode<synchronous>, transform_indices = @transform_7, window_bounds = array<i64: 1, 32>}, {pipeline_mode = #tpu.pipeline_mode<synchronous>, transform_indices = @transform_8, window_bounds = array<i64: 32, 32>}, {pipeline_mode = #tpu.pipeline_mode<synchronous>, transform_indices = @transform_9, window_bounds = array<i64: 1, 32>}, {transform_indices = @transform_10, window_bounds = array<i64: 1, 8, 32>}]} {
    %c0 = arith.constant 0 : index
    %c0_0 = arith.constant 0 : index
    %c0_1 = arith.constant 0 : index
    %0 = vector.load %arg2[%c0, %c0_0, %c0_1] : memref<1x8x32xf32, #tpu.memory_space<vmem>>, vector<1x8x32xf32>
    %1 = vector.shape_cast %0 : vector<1x8x32xf32> to vector<8x32xf32>
    %2 = arith.truncf %1 : vector<8x32xf32> to vector<8x32xbf16>
    %c0_2 = arith.constant 0 : index
    %c0_3 = arith.constant 0 : index
    %c0_4 = arith.constant 0 : index
    %3 = vector.load %arg3[%c0_2, %c0_3, %c0_4] : memref<1x8x32xf32, #tpu.memory_space<vmem>>, vector<1x8x32xf32>
    %4 = vector.shape_cast %3 : vector<1x8x32xf32> to vector<8x32xf32>
    %5 = arith.truncf %4 : vector<8x32xf32> to vector<8x32xbf16>
    %c0_5 = arith.constant 0 : index
    %c0_6 = arith.constant 0 : index
    %6 = vector.load %arg4[%c0_5, %c0_6] : memref<32x32xbf16, #tpu.memory_space<vmem>>, vector<32x32xbf16>
    %cst = arith.constant dense<0.000000e+00> : vector<8x32xf32>
    %7 = tpu.matmul %2, %6, %cst {dimension_numbers = #tpu.dot_dimension_numbers<[1], [0], [0], [1], [0, 0, 1, 1], [], []>} : vector<8x32xbf16>, vector<32x32xbf16>, vector<8x32xf32> -> vector<8x32xf32>
    %c0_7 = arith.constant 0 : index
    %c0_8 = arith.constant 0 : index
    %8 = vector.load %arg7[%c0_7, %c0_8] : memref<1x32xf32, #tpu.memory_space<vmem>>, vector<1x32xf32>
    %9 = vector.broadcast %8 : vector<1x32xf32> to vector<8x32xf32>
    %10 = arith.addf %7, %9 : vector<8x32xf32>
    %c0_9 = arith.constant 0 : index
    %c0_10 = arith.constant 0 : index
    %11 = vector.load %arg5[%c0_9, %c0_10] : memref<32x32xbf16, #tpu.memory_space<vmem>>, vector<32x32xbf16>
    %cst_11 = arith.constant dense<0.000000e+00> : vector<8x32xf32>
    %12 = tpu.matmul %5, %11, %cst_11 {dimension_numbers = #tpu.dot_dimension_numbers<[1], [0], [0], [1], [0, 0, 1, 1], [], []>} : vector<8x32xbf16>, vector<32x32xbf16>, vector<8x32xf32> -> vector<8x32xf32>
    %c0_12 = arith.constant 0 : index
    %c0_13 = arith.constant 0 : index
    %13 = vector.load %arg8[%c0_12, %c0_13] : memref<1x32xf32, #tpu.memory_space<vmem>>, vector<1x32xf32>
    %14 = vector.broadcast %13 : vector<1x32xf32> to vector<8x32xf32>
    %15 = arith.addf %12, %14 : vector<8x32xf32>
    %c0_14 = arith.constant 0 : index
    %c0_15 = arith.constant 0 : index
    %16 = vector.load %arg6[%c0_14, %c0_15] : memref<32x32xbf16, #tpu.memory_space<vmem>>, vector<32x32xbf16>
    %cst_16 = arith.constant dense<0.000000e+00> : vector<8x32xf32>
    %17 = tpu.matmul %5, %16, %cst_16 {dimension_numbers = #tpu.dot_dimension_numbers<[1], [0], [0], [1], [0, 0, 1, 1], [], []>} : vector<8x32xbf16>, vector<32x32xbf16>, vector<8x32xf32> -> vector<8x32xf32>
    %c0_17 = arith.constant 0 : index
    %c0_18 = arith.constant 0 : index
    %18 = vector.load %arg9[%c0_17, %c0_18] : memref<1x32xf32, #tpu.memory_space<vmem>>, vector<1x32xf32>
    %19 = vector.broadcast %18 : vector<1x32xf32> to vector<8x32xf32>
    %20 = arith.addf %17, %19 : vector<8x32xf32>
    %c0_19 = arith.constant 0 : index
    %c0_20 = arith.constant 0 : index
    %21 = vector.load %arg11[%c0_19, %c0_20] : memref<1x32xf32, #tpu.memory_space<vmem>>, vector<1x32xf32>
    %22 = vector.broadcast %21 : vector<1x32xf32> to vector<8x32xf32>
    %23 = arith.addf %1, %22 : vector<8x32xf32>
    %24 = vector.extract_strided_slice %10 {offsets = [0, 0], sizes = [8, 8], strides = [1, 1]} : vector<8x32xf32> to vector<8x8xf32>
    %25 = arith.truncf %24 : vector<8x8xf32> to vector<8x8xbf16>
    %26 = vector.extract_strided_slice %15 {offsets = [0, 0], sizes = [8, 8], strides = [1, 1]} : vector<8x32xf32> to vector<8x8xf32>
    %27 = arith.truncf %26 : vector<8x8xf32> to vector<8x8xbf16>
    %28 = vector.extract_strided_slice %20 {offsets = [0, 0], sizes = [8, 8], strides = [1, 1]} : vector<8x32xf32> to vector<8x8xf32>
    %29 = arith.truncf %28 : vector<8x8xf32> to vector<8x8xbf16>
    %30 = tpu.transpose %27, [1, 0] : vector<8x8xbf16> -> vector<8x8xbf16>
    %cst_21 = arith.constant dense<0.000000e+00> : vector<8x8xf32>
    %31 = tpu.matmul %25, %30, %cst_21 {dimension_numbers = #tpu.dot_dimension_numbers<[1], [0], [0], [1], [0, 0, 1, 1], [], []>} : vector<8x8xbf16>, vector<8x8xbf16>, vector<8x8xf32> -> vector<8x8xf32>
    %cst_22 = arith.constant dense<0xFF800000> : vector<8xf32>
    %32 = vector.multi_reduction <maximumf>, %31, %cst_22 [1] : vector<8x8xf32> to vector<8xf32>
    %33 = vector.shape_cast %32 : vector<8xf32> to vector<8x1xf32>
    %34 = vector.broadcast %33 : vector<8x1xf32> to vector<8x8xf32>
    %35 = arith.subf %31, %34 : vector<8x8xf32>
    %36 = math.exp %35 : vector<8x8xf32>
    %cst_23 = arith.constant dense<0.000000e+00> : vector<8xf32>
    %37 = vector.multi_reduction <add>, %36, %cst_23 [1] : vector<8x8xf32> to vector<8xf32>
    %38 = vector.shape_cast %37 : vector<8xf32> to vector<8x1xf32>
    %39 = tpu.reciprocal %38 {approx = true} : vector<8x1xf32> -> vector<8x1xf32>
    %40 = arith.truncf %36 : vector<8x8xf32> to vector<8x8xbf16>
    %cst_24 = arith.constant dense<0.000000e+00> : vector<8x8xf32>
    %41 = tpu.matmul %40, %29, %cst_24 {dimension_numbers = #tpu.dot_dimension_numbers<[1], [0], [0], [1], [0, 0, 1, 1], [], []>} : vector<8x8xbf16>, vector<8x8xbf16>, vector<8x8xf32> -> vector<8x8xf32>
    %42 = vector.broadcast %39 : vector<8x1xf32> to vector<8x8xf32>
    %43 = arith.mulf %41, %42 : vector<8x8xf32>
    %44 = arith.truncf %43 : vector<8x8xf32> to vector<8x8xbf16>
    %c0_25 = arith.constant 0 : index
    %c0_26 = arith.constant 0 : index
    %45 = vector.load %arg10[%c0_25, %c0_26] : memref<32x32xbf16, #tpu.memory_space<vmem>>, vector<8x32xbf16>
    %cst_27 = arith.constant dense<0.000000e+00> : vector<8x32xf32>
    %46 = tpu.matmul %44, %45, %cst_27 {dimension_numbers = #tpu.dot_dimension_numbers<[1], [0], [0], [1], [0, 0, 1, 1], [], []>} : vector<8x8xbf16>, vector<8x32xbf16>, vector<8x32xf32> -> vector<8x32xf32>
    %47 = arith.addf %23, %46 : vector<8x32xf32>
    %48 = vector.extract_strided_slice %10 {offsets = [0, 8], sizes = [8, 8], strides = [1, 1]} : vector<8x32xf32> to vector<8x8xf32>
    %49 = arith.truncf %48 : vector<8x8xf32> to vector<8x8xbf16>
    %50 = vector.extract_strided_slice %15 {offsets = [0, 8], sizes = [8, 8], strides = [1, 1]} : vector<8x32xf32> to vector<8x8xf32>
    %51 = arith.truncf %50 : vector<8x8xf32> to vector<8x8xbf16>
    %52 = vector.extract_strided_slice %20 {offsets = [0, 8], sizes = [8, 8], strides = [1, 1]} : vector<8x32xf32> to vector<8x8xf32>
    %53 = arith.truncf %52 : vector<8x8xf32> to vector<8x8xbf16>
    %54 = tpu.transpose %51, [1, 0] : vector<8x8xbf16> -> vector<8x8xbf16>
    %cst_28 = arith.constant dense<0.000000e+00> : vector<8x8xf32>
    %55 = tpu.matmul %49, %54, %cst_28 {dimension_numbers = #tpu.dot_dimension_numbers<[1], [0], [0], [1], [0, 0, 1, 1], [], []>} : vector<8x8xbf16>, vector<8x8xbf16>, vector<8x8xf32> -> vector<8x8xf32>
    %cst_29 = arith.constant dense<0xFF800000> : vector<8xf32>
    %56 = vector.multi_reduction <maximumf>, %55, %cst_29 [1] : vector<8x8xf32> to vector<8xf32>
    %57 = vector.shape_cast %56 : vector<8xf32> to vector<8x1xf32>
    %58 = vector.broadcast %57 : vector<8x1xf32> to vector<8x8xf32>
    %59 = arith.subf %55, %58 : vector<8x8xf32>
    %60 = math.exp %59 : vector<8x8xf32>
    %cst_30 = arith.constant dense<0.000000e+00> : vector<8xf32>
    %61 = vector.multi_reduction <add>, %60, %cst_30 [1] : vector<8x8xf32> to vector<8xf32>
    %62 = vector.shape_cast %61 : vector<8xf32> to vector<8x1xf32>
    %63 = tpu.reciprocal %62 {approx = true} : vector<8x1xf32> -> vector<8x1xf32>
    %64 = arith.truncf %60 : vector<8x8xf32> to vector<8x8xbf16>
    %cst_31 = arith.constant dense<0.000000e+00> : vector<8x8xf32>
    %65 = tpu.matmul %64, %53, %cst_31 {dimension_numbers = #tpu.dot_dimension_numbers<[1], [0], [0], [1], [0, 0, 1, 1], [], []>} : vector<8x8xbf16>, vector<8x8xbf16>, vector<8x8xf32> -> vector<8x8xf32>
    %66 = vector.broadcast %63 : vector<8x1xf32> to vector<8x8xf32>
    %67 = arith.mulf %65, %66 : vector<8x8xf32>
    %68 = arith.truncf %67 : vector<8x8xf32> to vector<8x8xbf16>
    %c8 = arith.constant 8 : index
    %c0_32 = arith.constant 0 : index
    %69 = vector.load %arg10[%c8, %c0_32] : memref<32x32xbf16, #tpu.memory_space<vmem>>, vector<8x32xbf16>
    %cst_33 = arith.constant dense<0.000000e+00> : vector<8x32xf32>
    %70 = tpu.matmul %68, %69, %cst_33 {dimension_numbers = #tpu.dot_dimension_numbers<[1], [0], [0], [1], [0, 0, 1, 1], [], []>} : vector<8x8xbf16>, vector<8x32xbf16>, vector<8x32xf32> -> vector<8x32xf32>
    %71 = arith.addf %47, %70 : vector<8x32xf32>
    %72 = vector.extract_strided_slice %10 {offsets = [0, 16], sizes = [8, 8], strides = [1, 1]} : vector<8x32xf32> to vector<8x8xf32>
    %73 = arith.truncf %72 : vector<8x8xf32> to vector<8x8xbf16>
    %74 = vector.extract_strided_slice %15 {offsets = [0, 16], sizes = [8, 8], strides = [1, 1]} : vector<8x32xf32> to vector<8x8xf32>
    %75 = arith.truncf %74 : vector<8x8xf32> to vector<8x8xbf16>
    %76 = vector.extract_strided_slice %20 {offsets = [0, 16], sizes = [8, 8], strides = [1, 1]} : vector<8x32xf32> to vector<8x8xf32>
    %77 = arith.truncf %76 : vector<8x8xf32> to vector<8x8xbf16>
    %78 = tpu.transpose %75, [1, 0] : vector<8x8xbf16> -> vector<8x8xbf16>
    %cst_34 = arith.constant dense<0.000000e+00> : vector<8x8xf32>
    %79 = tpu.matmul %73, %78, %cst_34 {dimension_numbers = #tpu.dot_dimension_numbers<[1], [0], [0], [1], [0, 0, 1, 1], [], []>} : vector<8x8xbf16>, vector<8x8xbf16>, vector<8x8xf32> -> vector<8x8xf32>
    %cst_35 = arith.constant dense<0xFF800000> : vector<8xf32>
    %80 = vector.multi_reduction <maximumf>, %79, %cst_35 [1] : vector<8x8xf32> to vector<8xf32>
    %81 = vector.shape_cast %80 : vector<8xf32> to vector<8x1xf32>
    %82 = vector.broadcast %81 : vector<8x1xf32> to vector<8x8xf32>
    %83 = arith.subf %79, %82 : vector<8x8xf32>
    %84 = math.exp %83 : vector<8x8xf32>
    %cst_36 = arith.constant dense<0.000000e+00> : vector<8xf32>
    %85 = vector.multi_reduction <add>, %84, %cst_36 [1] : vector<8x8xf32> to vector<8xf32>
    %86 = vector.shape_cast %85 : vector<8xf32> to vector<8x1xf32>
    %87 = tpu.reciprocal %86 {approx = true} : vector<8x1xf32> -> vector<8x1xf32>
    %88 = arith.truncf %84 : vector<8x8xf32> to vector<8x8xbf16>
    %cst_37 = arith.constant dense<0.000000e+00> : vector<8x8xf32>
    %89 = tpu.matmul %88, %77, %cst_37 {dimension_numbers = #tpu.dot_dimension_numbers<[1], [0], [0], [1], [0, 0, 1, 1], [], []>} : vector<8x8xbf16>, vector<8x8xbf16>, vector<8x8xf32> -> vector<8x8xf32>
    %90 = vector.broadcast %87 : vector<8x1xf32> to vector<8x8xf32>
    %91 = arith.mulf %89, %90 : vector<8x8xf32>
    %92 = arith.truncf %91 : vector<8x8xf32> to vector<8x8xbf16>
    %c16 = arith.constant 16 : index
    %c0_38 = arith.constant 0 : index
    %93 = vector.load %arg10[%c16, %c0_38] : memref<32x32xbf16, #tpu.memory_space<vmem>>, vector<8x32xbf16>
    %cst_39 = arith.constant dense<0.000000e+00> : vector<8x32xf32>
    %94 = tpu.matmul %92, %93, %cst_39 {dimension_numbers = #tpu.dot_dimension_numbers<[1], [0], [0], [1], [0, 0, 1, 1], [], []>} : vector<8x8xbf16>, vector<8x32xbf16>, vector<8x32xf32> -> vector<8x32xf32>
    %95 = arith.addf %71, %94 : vector<8x32xf32>
    %96 = vector.extract_strided_slice %10 {offsets = [0, 24], sizes = [8, 8], strides = [1, 1]} : vector<8x32xf32> to vector<8x8xf32>
    %97 = arith.truncf %96 : vector<8x8xf32> to vector<8x8xbf16>
    %98 = vector.extract_strided_slice %15 {offsets = [0, 24], sizes = [8, 8], strides = [1, 1]} : vector<8x32xf32> to vector<8x8xf32>
    %99 = arith.truncf %98 : vector<8x8xf32> to vector<8x8xbf16>
    %100 = vector.extract_strided_slice %20 {offsets = [0, 24], sizes = [8, 8], strides = [1, 1]} : vector<8x32xf32> to vector<8x8xf32>
    %101 = arith.truncf %100 : vector<8x8xf32> to vector<8x8xbf16>
    %102 = tpu.transpose %99, [1, 0] : vector<8x8xbf16> -> vector<8x8xbf16>
    %cst_40 = arith.constant dense<0.000000e+00> : vector<8x8xf32>
    %103 = tpu.matmul %97, %102, %cst_40 {dimension_numbers = #tpu.dot_dimension_numbers<[1], [0], [0], [1], [0, 0, 1, 1], [], []>} : vector<8x8xbf16>, vector<8x8xbf16>, vector<8x8xf32> -> vector<8x8xf32>
    %cst_41 = arith.constant dense<0xFF800000> : vector<8xf32>
    %104 = vector.multi_reduction <maximumf>, %103, %cst_41 [1] : vector<8x8xf32> to vector<8xf32>
    %105 = vector.shape_cast %104 : vector<8xf32> to vector<8x1xf32>
    %106 = vector.broadcast %105 : vector<8x1xf32> to vector<8x8xf32>
    %107 = arith.subf %103, %106 : vector<8x8xf32>
    %108 = math.exp %107 : vector<8x8xf32>
    %cst_42 = arith.constant dense<0.000000e+00> : vector<8xf32>
    %109 = vector.multi_reduction <add>, %108, %cst_42 [1] : vector<8x8xf32> to vector<8xf32>
    %110 = vector.shape_cast %109 : vector<8xf32> to vector<8x1xf32>
    %111 = tpu.reciprocal %110 {approx = true} : vector<8x1xf32> -> vector<8x1xf32>
    %112 = arith.truncf %108 : vector<8x8xf32> to vector<8x8xbf16>
    %cst_43 = arith.constant dense<0.000000e+00> : vector<8x8xf32>
    %113 = tpu.matmul %112, %101, %cst_43 {dimension_numbers = #tpu.dot_dimension_numbers<[1], [0], [0], [1], [0, 0, 1, 1], [], []>} : vector<8x8xbf16>, vector<8x8xbf16>, vector<8x8xf32> -> vector<8x8xf32>
    %114 = vector.broadcast %111 : vector<8x1xf32> to vector<8x8xf32>
    %115 = arith.mulf %113, %114 : vector<8x8xf32>
    %116 = arith.truncf %115 : vector<8x8xf32> to vector<8x8xbf16>
    %c24 = arith.constant 24 : index
    %c0_44 = arith.constant 0 : index
    %117 = vector.load %arg10[%c24, %c0_44] : memref<32x32xbf16, #tpu.memory_space<vmem>>, vector<8x32xbf16>
    %cst_45 = arith.constant dense<0.000000e+00> : vector<8x32xf32>
    %118 = tpu.matmul %116, %117, %cst_45 {dimension_numbers = #tpu.dot_dimension_numbers<[1], [0], [0], [1], [0, 0, 1, 1], [], []>} : vector<8x8xbf16>, vector<8x32xbf16>, vector<8x32xf32> -> vector<8x32xf32>
    %119 = arith.addf %95, %118 : vector<8x32xf32>
    %c0_46 = arith.constant 0 : index
    %c0_47 = arith.constant 0 : index
    %c0_48 = arith.constant 0 : index
    %120 = vector.load %arg12[%c0_46, %c0_47, %c0_48] : memref<1x8x32xf32, #tpu.memory_space<vmem>>, vector<1x8x32xf32>
    %121 = vector.shape_cast %120 : vector<1x8x32xf32> to vector<8x32xf32>
    %122 = vector.shape_cast %119 : vector<8x32xf32> to vector<1x8x32xf32>
    tpu.vector_store %arg12[%c0_46, %c0_47, %c0_48], %122 {strides = array<i32>} : memref<1x8x32xf32, #tpu.memory_space<vmem>>, vector<1x8x32xf32>,
    return
  }
  func.func @transform_0(%arg0: i32, %arg1: i32) -> (i32, i32, i32) {
    %c0_i32 = arith.constant 0 : i32
    %c0_i32_0 = arith.constant 0 : i32
    return %arg0, %arg1, %c0_i32 : i32, i32, i32
  }
  func.func @transform_1(%arg0: i32, %arg1: i32) -> (i32, i32, i32) {
    %c0_i32 = arith.constant 0 : i32
    %c0_i32_0 = arith.constant 0 : i32
    %c0_i32_1 = arith.constant 0 : i32
    return %arg0, %c0_i32, %c0_i32_0 : i32, i32, i32
  }
  func.func @transform_2(%arg0: i32, %arg1: i32) -> (i32, i32) {
    %c0_i32 = arith.constant 0 : i32
    %c0_i32_0 = arith.constant 0 : i32
    %c0_i32_1 = arith.constant 0 : i32
    return %c0_i32, %c0_i32_0 : i32, i32
  }
  func.func @transform_3(%arg0: i32, %arg1: i32) -> (i32, i32) {
    %c0_i32 = arith.constant 0 : i32
    %c0_i32_0 = arith.constant 0 : i32
    %c0_i32_1 = arith.constant 0 : i32
    return %c0_i32, %c0_i32_0 : i32, i32
  }
  func.func @transform_4(%arg0: i32, %arg1: i32) -> (i32, i32) {
    %c0_i32 = arith.constant 0 : i32
    %c0_i32_0 = arith.constant 0 : i32
    %c0_i32_1 = arith.constant 0 : i32
    return %c0_i32, %c0_i32_0 : i32, i32
  }
  func.func @transform_5(%arg0: i32, %arg1: i32) -> (i32, i32) {
    %c0_i32 = arith.constant 0 : i32
    %c0_i32_0 = arith.constant 0 : i32
    %c0_i32_1 = arith.constant 0 : i32
    return %c0_i32, %c0_i32_0 : i32, i32
  }
  func.func @transform_6(%arg0: i32, %arg1: i32) -> (i32, i32) {
    %c0_i32 = arith.constant 0 : i32
    %c0_i32_0 = arith.constant 0 : i32
    %c0_i32_1 = arith.constant 0 : i32
    return %c0_i32, %c0_i32_0 : i32, i32
  }
  func.func @transform_7(%arg0: i32, %arg1: i32) -> (i32, i32) {
    %c0_i32 = arith.constant 0 : i32
    %c0_i32_0 = arith.constant 0 : i32
    %c0_i32_1 = arith.constant 0 : i32
    return %c0_i32, %c0_i32_0 : i32, i32
  }
  func.func @transform_8(%arg0: i32, %arg1: i32) -> (i32, i32) {
    %c0_i32 = arith.constant 0 : i32
    %c0_i32_0 = arith.constant 0 : i32
    %c0_i32_1 = arith.constant 0 : i32
    return %c0_i32, %c0_i32_0 : i32, i32
  }
  func.func @transform_9(%arg0: i32, %arg1: i32) -> (i32, i32) {
    %c0_i32 = arith.constant 0 : i32
    %c0_i32_0 = arith.constant 0 : i32
    %c0_i32_1 = arith.constant 0 : i32
    return %c0_i32, %c0_i32_0 : i32, i32
  }
  func.func @transform_10(%arg0: i32, %arg1: i32) -> (i32, i32, i32) {
    %c0_i32 = arith.constant 0 : i32
    %c0_i32_0 = arith.constant 0 : i32
    return %arg0, %arg1, %c0_i32 : i32, i32, i32
  }
}

</mosaic_0001>

<bundles_post_ra>
// kernel: tpu_custom_call.1
= control target key start
LH: loop header
LB: loop body
LE: loop exit
PB: predicated region body
PF: predicated region fallthrough
CT: control target
= control target key end

     0   :  { %s1882_s0 = inlined_call_operand.hbm [shape: f32[2,8,32], index: 0, kind: input, shape index: {}]   ;;  %s1883_s1 = inlined_call_operand.hbm [shape: f32[2,8,32], index: 1, kind: input, shape index: {}]   ;;  %s1884_s2 = inlined_call_operand.hbm [shape: bf16[32,32], index: 2, kind: input, shape index: {}]   ;;  %s1885_s3 = inlined_call_operand.hbm [shape: bf16[32,32], index: 3, kind: input, shape index: {}]   ;;  %s1886_s4 = inlined_call_operand.hbm [shape: bf16[32,32], index: 4, kind: input, shape index: {}]   ;;  %s1887_s5 = inlined_call_operand.vmem [shape: f32[1,32], index: 5, kind: input, shape index: {}]   ;;  %s1888_s6 = inlined_call_operand.vmem [shape: f32[1,32], index: 6, kind: input, shape index: {}]   ;;  %s1889_s7 = inlined_call_operand.vmem [shape: f32[1,32], index: 7, kind: input, shape index: {}]   ;;  %s1890_s8 = inlined_call_operand.hbm [shape: bf16[32,32], index: 8, kind: input, shape index: {}]   ;;  %s1891_s9 = inlined_call_operand.vmem [shape: f32[1,32], index: 9, kind: input, shape index: {}]   ;;  %s1892_s10 = inlined_call_operand.hbm [shape: f32[2,8,32], index: 10, kind: output, shape index: {}]  }
   0x1   :  { %1900 = sst [smem:[#allocation27_spill]] %s1884_s2 }
   0x2   :  { %1901 = sst [smem:[#allocation28_spill]] %s1885_s3 }
   0x3   :  { %1902 = sst [smem:[#allocation29_spill]] %s1886_s4 }
   0x4   :  { %1903 = sst [smem:[#allocation30_spill]] %s1890_s8 }
   0x5   :  { %15 = vsyncpa [#allocation3], 0 }
   0x6   :  { %17 = vsyncpa [#allocation3 + $0x1], 0 }
   0x7   :  { %18 = vsyncpa [#allocation6], 0 }
   0x8   :  { %20 = vsyncpa [#allocation6 + $0x1], 0 }
   0x9   :  { %21 = vsyncpa [#allocation9], 0 }
   0xa   :  { %22 = vsyncpa [#allocation12], 0 }
   0xb   :  { %23 = vsyncpa [#allocation4], 0 }
   0xc   :  { %25 = vsyncpa [#allocation4 + $0x1], 0  ;;  %s1634_s13 = smov 0   ;;  %s1636_s14 = smov 0  }
   0xd   :  { %s1638_s15 = smov 0   ;;  %s1640_s16 = smov 0  }
   0xe   :  { %s1642_s17 = smov 0   ;;  %s1644_s18 = smov 0  }
   0xf LB: > { %1904 = sst [smem:[#allocation20_spill]] %s1548_s13  ;;  %s1665_s19 = sadd.s32 4294967295, %s1568_s18   ;;  %s1568_s18 = sphi %s1644_s18, %s31_s18   ;;  %s1564_s17 = sphi %s1642_s17, %s1927_s17   ;;  %s1560_s16 = sphi %s1640_s16, %s1926_s16   ;;  %s1556_s15 = sphi %s1638_s15, %s1925_s15   ;;  %s1552_s14 = sphi %s1636_s14, %s1929_s14   ;;  %s1548_s13 = sphi %s1634_s13, %s1928_s13  }
  0x10   : > { %1905 = sst [smem:[#allocation21_spill]] %s1556_s15  ;;  %p1090_p0 = scmp.ge.s32.totalorder %s1568_s18, 1 }
  0x11   : > { %1906 = sst [smem:[#allocation22_spill]] %s1564_s17  ;;  %p66_p1 = scmp.eq.s32.totalorder %s1665_s19, 0 }
  0x12   : > { %p298_p2 = scmp.lt.s32.totalorder %s1568_s18, 3  ;;  %s1907_s2 = sld [smem:[#allocation27_spill]] }
  0x13   : > { %s1570_s24 = smov [#allocation7]   ;;  %p1095_p6 = scmp.ge.s32.totalorder %s1568_s18, 2 }
  0x14   : > { %p1673_p3 = pnand %p1090_p0, %p298_p2  ;;  %s311_s25 = sshll.u32 %s1570_s24, 4  ;;  %s312_s25 = int_to_ptr.vmem [resolvable:$true] %s311_s25 }
  0x15   : > { %s1910_s3 = sld [smem:[#allocation28_spill]]  ;;  %s1571_s30 = smov 64  }
  0x16   : > { %p1179_p4 = pneg %p1673_p3  ;;  %s1572_s11 = smov 4  }
  0x17   : > { %s1573_s12 = smov [#allocation8]   ;;  %s1911_s4 = sld [smem:[#allocation29_spill]] }
  0x18   : > { %s309_s22 = sshll.u32 %s1907_s2, 4  ;;  %p1681_p5 = pnand %p1179_p4, %p66_p1  ;;  %s310_s22 = int_to_ptr.hbm [resolvable:$true] %s309_s22 }
  0x19   : > { %s325_s20 = sshll.u32 %s1573_s12, 4  ;;  %s1912_s8 = sld [smem:[#allocation30_spill]]  ;;  %s326_s20 = int_to_ptr.vmem [resolvable:$true] %s325_s20 }
  0x1a   : > { %1182 = dma.hbm_to_vmem [thread:$0]  (!%p1681_p5), %s310_s22, 256, %s312_s25, [#allocation6], %s1571_s30, %s1571_s30, %s1572_s11  }
  0x1b   : > { %s323_s29 = sshll.u32 %s1910_s3, 4  ;;  %s1574_s25 = smov [#allocation10]   ;;  %s324_s29 = int_to_ptr.hbm [resolvable:$true] %s323_s29 }
  0x1c   : > { %1185 = dma.hbm_to_vmem [thread:$0]  (!%p1681_p5), %s324_s29, 256, %s326_s20, [#allocation9], %s1571_s30, %s1571_s30, %s1572_s11  }
  0x1d   : > { %s337_s2 = sshll.u32 %s1911_s4, 4  ;;  %s339_s3 = sshll.u32 %s1574_s25, 4  ;;  %s338_s2 = int_to_ptr.hbm [resolvable:$true] %s337_s2  ;;  %s340_s3 = int_to_ptr.vmem [resolvable:$true] %s339_s3 }
  0x1e   : > { %1188 = dma.hbm_to_vmem [thread:$0]  (!%p1681_p5), %s338_s2, 256, %s340_s3, [#allocation9], %s1571_s30, %s1571_s30, %s1572_s11  }
  0x1f   : > { %s360_s22 = sshll.u32 %s1912_s8, 4  ;;  %s1575_s12 = smov [#allocation11]   ;;  %s361_s22 = int_to_ptr.hbm [resolvable:$true] %s360_s22 }
  0x20   : > { %s362_s21 = sshll.u32 %s1575_s12, 4  ;;  %s1089_s29 = sadd.s32 4294967294, %s1568_s18   ;;  %s363_s21 = int_to_ptr.vmem [resolvable:$true] %s362_s21 }
  0x21   : > { %1191 = dma.hbm_to_vmem [thread:$0]  (!%p1681_p5), %s361_s22, 256, %s363_s21, [#allocation12], %s1571_s30, %s1571_s30, %s1572_s11  }
  0x22   : > { %s43_s20 = sadd.s32 1, %s1564_s17  ;;  %s52_s24 = sadd.s32 1, %s1556_s15 }
  0x23   : > { %p45_p7 = scmp.ge.s32.totalorder %s43_s20, 2  ;;  %p59_p8 = scmp.ne.s32.totalorder %s1556_s15, %s1552_s14 }
  0x24   : > { %p60_p9 = scmp.eq.s32.totalorder %s1568_s18, 0  ;;  %p65_p11 = scmp.ne.s32.totalorder %s1552_s14, %s1548_s13 }
  0x25   : > { %s1931_s20 = smov (%p45_p7, %s43_s20), 0  ;;  %p285_p12 = scmp.eq.s32.totalorder %s1665_s19, 1 }
  0x26   : > { %1913 = sst [smem:[#allocation23_spill]] %s1931_s20  ;;  %p1711_p10 = por %p60_p9, %p59_p8 }
  0x27   : > { %s47_s3 = ssub.s32 %s1564_s17, %s1931_s20  ;;  %p1722_p0 = por %p66_p1, %p65_p11 }
  0x28   : > { %p50_p13 = scmp.eq.s32.totalorder %s47_s3, 0  ;;  %p1726_p2 = por %p285_p12, %p59_p8 }
  0x29   : > { %p291_p4 = scmp.eq.s32.totalorder %s1089_s29, 1  ;;  %p1207_p7 = scmp.lt.s32.totalorder %s1568_s18, 2 }
  0x2a   : > { %s1916_s30 = scalar_select %p1726_p2, 1, 0 }
  0x2b   : > { %s1731_s11 = scalar_select %p50_p13, %s1556_s15, %s52_s24  }
  0x2c   : > { %1917 = sst [smem:[#allocation24_spill]] %s1916_s30  ;;  %p1733_p5 = por %p291_p4, %p65_p11 }
  0x2d   : > { %1918 = sst [smem:[#allocation25_spill]] %s1731_s11  ;;  %s379_s28 = sand.u32 1, %s1556_s15  }
  0x2e   : > { %s1919_s27 = scalar_select %p1733_p5, 1, 0 }
  0x2f   : > { %s1097_s22 = sshll.u32 %s1564_s17, 3  ;;  %s1096_s25 = sshll.u32 %s379_s28, 3 }
  0x30   : > { %1920 = sst [smem:[#allocation26_spill]] %s1919_s27  ;;  %s388_s3 = scalar_lea.hbm %s1882_s0, %s1097_s22 }
  0x31   : > { %s390_s4 = sshll.u32 %s388_s3, 4  ;;  %s383_s8 = scalar_lea.vmem [#allocation2], %s1096_s25  ;;  %s391_s4 = int_to_ptr.hbm [resolvable:$true] %s390_s4 }
  0x32   : > { %s392_s20 = sshll.u32 %s383_s8, 4  ;;  %p1193_p8 = pnand %p1207_p7, %p1711_p10  ;;  %s393_s20 = int_to_ptr.vmem [resolvable:$true] %s392_s20 }
  0x33   : > { %s407_s11 = scalar_lea.hbm %s1883_s1, %s1097_s22  ;;  %s399_s27 = sand.u32 1, %s1568_s18  }
  0x34   : > { %s380_s13 = scalar_lea.sflag [#allocation3], %s379_s28  ;;  %s409_s17 = sshll.u32 %s407_s11, 4  ;;  %s410_s17 = int_to_ptr.hbm [resolvable:$true] %s409_s17 }
  0x35   : > { %1195 = dma.hbm_to_vmem [thread:$0]  (!%p1193_p8), %s391_s4, 128, %s393_s20, %s380_s13  }
  0x36   : > { %s403_s15 = scalar_lea.vmem [#allocation5], %s1096_s25  ;;  %s400_s12 = scalar_lea.sflag [#allocation6], %s399_s27 }
  0x37   : > { %s411_s30 = sshll.u32 %s403_s15, 4  ;;  %420 = sbr.rel (%p1673_p3) target bundleno = 1287 (0x507), region = 60  ;;  %s412_s30 = int_to_ptr.vmem [resolvable:$true] %s411_s30 }
  0x38   : > { %1198 = dma.hbm_to_vmem [thread:$0]  (!%p1193_p8), %s410_s17, 128, %s412_s30, %s400_s12  }
  0x39   : > { %s1752_s8 = sand.u32 (!%p1673_p3), 1, %s1552_s14  }
  0x3a   : > { %s1755_s2 = sshll.u32 (!%p1673_p3), %s1752_s8, 3  ;;  %s423_s4 = scalar_lea.sflag (!%p1673_p3), [#allocation3], %s1752_s8 }
  0x3b   : > { %s426_s13 = scalar_lea.vmem (!%p1673_p3), [#allocation2], %s1755_s2 }
  0x3c   : > { %1523 = dma.done.wait (%p1722_p0), %s423_s4, 128  }
  0x3d   : > { %1525 = vsyncadd (%p1722_p0), %s423_s4, 4294967168  ;;  %s432_s15 = sand.u32 1, %s1665_s19   ;;  %s436_s23 = scalar_lea.vmem [#allocation5], %s1755_s2 }
  0x3e   : > { %s433_s17 = scalar_lea.sflag [#allocation6], %s432_s15 }
  0x3f   : > { %1527 = dma.done.wait (%p1722_p0), %s433_s17, 128  }
  0x40   : > { %1529 = vsyncadd (%p1722_p0), %s433_s17, 4294967168 }
  0x41   : > { %1531 = dma.done.wait (%p66_p1), [#allocation6], 256  }
  0x42   : > { %1533 = vsyncadd (%p66_p1), [#allocation6], 4294967040 }
  0x43   : > { %1535 = dma.done.wait (%p66_p1), [#allocation9], 512  }
  0x44   : > { %1537 = vsyncadd (%p66_p1), [#allocation9], 4294966784 }
  0x45   : > { %1539 = dma.done.wait (%p66_p1), [#allocation12], 256  }
  0x46   : > { %1541 = vsyncadd (%p66_p1), [#allocation12], 4294967040  ;;  %v1152_v0 = vld [vmem:[#allocation7 + $0x8] sm:$0xff]  ;;  %v1154_v1 = vld [vmem:[#allocation8 + $0x8] sm:$0xff]  ;;  %vm524_vm0 = vcmask 261120   ;;  %vm618_vm1 = vcmask 64512  }
  0x47   : > { %v1151_v2 = vld [vmem:[#allocation7] sm:$0xff]  ;;  %v1153_v3 = vld [vmem:[#allocation8] sm:$0xff]  ;;  %534 = vmatpush.bf16.msra.mxu0 %v1152_v0  ;;  %570 = vmatpush.bf16.msra.mxu1 %v1154_v1  ;;  %v1156_v8 = vld [vmem:[#allocation10 + $0x8] sm:$0xff]  ;;  %s1576_s11 = smov 120   ;;  %vm652_vm2 = vcmask 1043456   ;;  %s1577_s22 = smov 112  }
  0x48   : > { %v1781_v4 = vld [vmem:[%s426_s13] sm:$0xff]  ;;  %v502_v5 = vld [vmem:[%s436_s23] sm:$0xff]  ;;  %603 = vmatpush.bf16.msra.mxu2 %v1156_v8  ;;  %s1578_s25 = smov 104   ;;  %s1148_s29 = sshll.u32 %s1560_s16, 3 }
  0x49   : > { %v501_v6 = vpack.c.bf16 %v1781_v4, %v1781_v4  ;;  %v503_v7 = vpack.c.bf16 %v502_v5, %v502_v5  ;;  %v1155_v9 = vld [vmem:[#allocation10] sm:$0xff]  ;;  %v671_v44 = vld [vmem:[#allocation11] sm:$0xf]  ;;  %v752_v46 = vld [vmem:[#allocation11 + $0x4] sm:$0xf]  ;;  %s942_s13 = scalar_lea.hbm %s1892_s10, %s1148_s29  ;;  %s498_s15 = scalar_lea.vmem [#allocation13], %s1755_s2 }
  0x4a   : > { %v1271_v10 = vld [vmem:[%s1888_s6] ss:$0 sm:$0xff]  ;;  %v676_v45 = vsel %vm652_vm2, %v671_v44, 0  ;;  %v757_v48 = vsel %vm652_vm2, %v752_v46, 0  ;;  %s944_s17 = sshll.u32 %s498_s15, 4  ;;  %s946_s23 = sshll.u32 %s942_s13, 4  ;;  %s945_s17 = int_to_ptr.vmem [resolvable:$true] %s944_s17  ;;  %s947_s23 = int_to_ptr.hbm [resolvable:$true] %s946_s23 }
  0x4b   : > { %535 = vmatpush.bf16.msra.mxu0 %v1151_v2  ;;  %571 = vmatpush.bf16.msra.mxu1 %v1153_v3  ;;  %v1270_v13 = vld [vmem:[%s1887_s5] ss:$0 sm:$0xff]  ;;  %s931_s19 = scalar_lea.sflag [#allocation4], %s1752_s8  ;;  %s1484_s20 = sshra.s32 %s947_s23, 4  ;;  %s1485_s20 = int_to_ptr.hbm [resolvable:$true] %s1484_s20 }
  0x4c   : > { %604 = vmatpush.bf16.msra.mxu2 %v1155_v9  ;;  %v1272_v23 = vld [vmem:[%s1889_s7] ss:$0 sm:$0xff]  ;;  %s1486_s26 = scalar_lea.hbm %s1485_s20, 8  ;;  %s1490_s2 = scalar_lea.hbm %s1892_s10, 16 }
  0x4d   : > { %p1487_p1 = scmp.ne.s32.totalorder %s1485_s20, %s1486_s26  ;;  %p1491_p10 = scmp.lt.s32.totalorder %s1485_s20, %s1892_s10 }
  0x4e   : > { %1116 = vmatmul.msk.bf16.vlgmr.msra.gmra.mxu0 %vm524_vm0, %v501_v6  ;;  %1125 = vmatmul.msk.bf16.vlgmr.msra.gmra.mxu1 %vm524_vm0, %v503_v7  ;;  %p1492_p11 = scmp.lt.s32.totalorder %s1490_s2, %s1486_s26 }
  0x4f   : > { %1134 = vmatmul.msk.bf16.vlgmr.msra.gmra.mxu2 %vm524_vm0, %v503_v7  ;;  %685 = vmatpush.bf16.msrb.mxu1 %v676_v45  ;;  %p1488_p3 = pnand %p1487_p1, %p1726_p2 }
  0x50   : > { %p1493_p12 = por %p1492_p11, %p1491_p10 }
  0x51   : > { %p1489_p9 = pneg %p1488_p3 }
  0x53   : > { %p1494_p13 = pnand %p1493_p12, %p1489_p9 }
  0xcb   : > { %v537_v11 = vpop.f32.mrf.mxu0  ;;  %v573_v12 = vpop.f32.mrf.mxu1 }
  0xcc   : > { %v574_v14 = vadd.f32 %v1271_v10, %v573_v12  ;;  %v538_v16 = vadd.f32 %v1270_v13, %v537_v11 }
  0xce   : > { %v616_v15 = vpack.c.bf16 %v574_v14, %v574_v14  ;;  %v615_v20 = vpack.c.bf16 %v538_v16, %v538_v16  ;;  %v1273_v16 = vld [vmem:[%s1891_s9] ss:$0 sm:$0xff] }
  0xd0   : > { %696 = vrot.lane.b32.xlu0 %v616_v15, %s1576_s11  ;;  %v623_v17 = vsel %vm618_vm1, %v616_v15, 0 }
  0xd1   : > { %632 = vmatpush.bf16.xpose.msra.mxu3 %v623_v17  ;;  %v614_v17 = vadd.f32 %v1273_v16, %v1781_v4 }
  0xd2   : > { %v606_v24 = vpop.f32.mrf.mxu2 }
  0xd3   : > { %v539_v18 = vpop.f32.mrf.mxu0  ;;  %v575_v19 = vpop.f32.mrf.mxu1  ;;  %v607_v25 = vadd.f32 %v1272_v23, %v606_v24 }
  0xd5   : > { %v1800_v26 = vpack.c.bf16 %v607_v25, %v607_v25 }
  0xd7   : > { %729 = vrot.lane.b32.xlu2 %v1800_v26, %s1576_s11  ;;  %v654_v27 = vsel %vm652_vm2, %v1800_v26, 0 }
  0xd8   : > { %693 = vrot.lane.b32.xlu0 %v615_v20, %s1576_s11  ;;  %1135 = vmatmul.msk.bf16.vlgmr.msra.gmra.mxu3 %vm618_vm1, %v615_v20 }
  0xd9   : > { %663 = vmatpush.bf16.msrb.mxu0 %v654_v27 }
  0xda   : > { %v608_v29 = vpop.f32.mrf.mxu2 }
  0xdd   : > { %766 = vmatpush.bf16.msra.mxu0 %v757_v48 }
 0x131   : > { %v730_v42 = vpop.permute.xlu2 %729 }
 0x132   : > { %v735_v43 = vsel %vm652_vm2, %v730_v42, 0 }
 0x133   : > { %744 = vmatpush.bf16.msrb.mxu3 %v735_v43 }
 0x142   : > { %v697_v21 = vpop.permute.xlu0 %696 }
 0x143   : > { %v702_v22 = vsel %vm618_vm1, %v697_v21, 0 }
 0x144   : > { %711 = vmatpush.bf16.xpose.msrb.mxu2 %v702_v22 }
 0x14a   : > { %v694_v28 = vpop.permute.xlu0 %693 }
 0x14b   : > { %1138 = vmatmul.msk.bf16.vlgmr.msrb.gmra.mxu2 %vm618_vm1, %v694_v28 }
 0x15b   : > { %v634_v30 = vpop.f32.mrf.mxu3 }
 0x15c   : > { %v638_v31 = vsel %vm618_vm1, %v634_v30, -inf }
 0x15d   : > { %639 = vmax.xlane.f32.xlu1 %v638_v31 }
 0x163   : > { %v636_v32 = vpop.f32.mrf.mxu3 }
 0x1ce   : > { %v713_v33 = vpop.f32.mrf.mxu2 }
 0x1cf   : > { %v717_v34 = vsel %vm618_vm1, %v713_v33, -inf }
 0x1d0   : > { %718 = vmax.xlane.f32.xlu1 %v717_v34  ;;  %v640_v35 = vpop.xlane.xlu1 %639 }
 0x1d1   : > { %v641_v36 = vsub.f32 %v634_v30, %v640_v35 }
 0x1d3   : > { %v642_v37 = vmul.f32 1.442695, %v641_v36 }
 0x1d5   : > { %1274 = vpow2.f32 %v642_v37 }
 0x1d6   : > { %v715_v38 = vpop.f32.mrf.mxu2 }
 0x1db   : > { %v1275_v39 = vpop.eup %1274 }
 0x1dc   : > { %v644_v40 = vsel %vm618_vm1, %v1275_v39, 0.0  ;;  %v648_v41 = vpack.c.bf16 %v1275_v39, %v1275_v39  ;;  %v908_v39 = vld [vmem:[#allocation11 + $0xc] sm:$0xf] }
 0x1dd   : > { %645 = vadd.xlane.f32.xlu2 %v644_v40  ;;  %v830_v40 = vld [vmem:[#allocation11 + $0x8] sm:$0xf] }
 0x1de   : > { %1136 = vmatmul.msk.bf16.vlgmr.msrb.gmra.mxu0 %vm618_vm1, %v648_v41  ;;  %v835_v41 = vsel %vm652_vm2, %v830_v40, 0 }
 0x1df   : > { %844 = vmatpush.bf16.msra.mxu3 %v835_v41 }
 0x1e9   : > { %775 = vrot.lane.b32.xlu1 %v616_v15, %s1577_s22 }
 0x1f1   : > { %853 = vrot.lane.b32.xlu1 %v616_v15, %s1578_s25 }
 0x1f5   : > { %851 = vrot.lane.b32.xlu2 %v615_v20, %s1578_s25 }
 0x1f9   : > { %773 = vrot.lane.b32.xlu1 %v615_v20, %s1577_s22 }
 0x1fd   : > { %885 = vrot.lane.b32.xlu2 %v1800_v26, %s1578_s25 }
 0x243   : > { %v719_v47 = vpop.xlane.xlu1 %718 }
 0x244   : > { %v720_v49 = vsub.f32 %v713_v33, %v719_v47 }
 0x246   : > { %v721_v50 = vmul.f32 1.442695, %v720_v49 }
 0x248   : > { %1276 = vpow2.f32 %v721_v50 }
 0x24e   : > { %v1277_v51 = vpop.eup %1276 }
 0x24f   : > { %v723_v52 = vsel %vm618_vm1, %v1277_v51, 0.0  ;;  %v727_v53 = vpack.c.bf16 %v1277_v51, %v1277_v51 }
 0x250   : > { %v646_v54 = vpop.xlane.xlu2 %645  ;;  %724 = vadd.xlane.f32.xlu0 %v723_v52 }
 0x251   : > { %1139 = vmatmul.msk.bf16.vlgmr.msrb.gmra.mxu3 %vm618_vm1, %v727_v53  ;;  %1278 = vrcp.f32 %v646_v54 }
 0x257   : > { %v1279_v56 = vpop.eup %1278 }
 0x258   : > { %v852_v55 = vpop.permute.xlu2 %851 }
 0x25b   : > { %v665_v57 = vpop.f32.mrf.mxu0  ;;  %v776_v58 = vpop.permute.xlu1 %775 }
 0x25c   : > { %v669_v59 = vmul.f32 %v1279_v56, %v665_v57  ;;  %v781_v60 = vsel %vm618_vm1, %v776_v58, 0 }
 0x25d   : > { %790 = vmatpush.bf16.xpose.msra.mxu1 %v781_v60 }
 0x25e   : > { %v670_v61 = vpack.c.bf16 %v669_v59, %v669_v59 }
 0x260   : > { %1137 = vmatmul.msk.bf16.vlgmr.msrb.gmra.mxu1 %vm618_vm1, %v670_v61  ;;  %v886_v62 = vpop.permute.xlu2 %885 }
 0x261   : > { %v891_v63 = vsel %vm652_vm2, %v886_v62, 0 }
 0x263   : > { %v667_v0 = vpop.f32.mrf.mxu0  ;;  %v854_v1 = vpop.permute.xlu1 %853 }
 0x264   : > { %v859_v2 = vsel %vm618_vm1, %v854_v1, 0 }
 0x265   : > { %900 = vmatpush.bf16.msrb.mxu1 %v891_v63  ;;  %868 = vmatpush.bf16.xpose.msrb.mxu0 %v859_v2 }
 0x26b   : > { %v774_v3 = vpop.permute.xlu1 %773 }
 0x270   : > { %1141 = vmatmul.msk.bf16.vlgmr.msra.gmra.mxu1 %vm618_vm1, %v774_v3 }
 0x2c3   : > { %v725_v5 = vpop.xlane.xlu0 %724 }
 0x2c4   : > { %1280 = vrcp.f32 %v725_v5 }
 0x2ca   : > { %v1281_v6 = vpop.eup %1280 }
 0x2d4   : > { %v746_v7 = vpop.f32.mrf.mxu3 }
 0x2d5   : > { %v750_v8 = vmul.f32 %v1281_v6, %v746_v7 }
 0x2d7   : > { %v751_v9 = vpack.c.bf16 %v750_v8, %v750_v8 }
 0x2d9   : > { %1140 = vmatmul.msk.bf16.vlgmr.msra.gmra.mxu0 %vm618_vm1, %v751_v9 }
 0x2dc   : > { %v748_v10 = vpop.f32.mrf.mxu3 }
 0x2dd   : > { %v687_v11 = vpop.f32.mrf.mxu1 }
 0x2de   : > { %v691_v18 = vadd.f32 %v687_v11, %v614_v17 }
 0x2e5   : > { %v689_v12 = vpop.f32.mrf.mxu1 }
 0x2e9   : > { %1144 = vmatmul.msk.bf16.vlgmr.msrb.gmra.mxu0 %vm618_vm1, %v852_v55 }
 0x2ed   : > { %v792_v13 = vpop.f32.mrf.mxu1 }
 0x2ee   : > { %v796_v14 = vsel %vm618_vm1, %v792_v13, -inf }
 0x2ef   : > { %797 = vmax.xlane.f32.xlu1 %v796_v14 }
 0x2f5   : > { %v794_v15 = vpop.f32.mrf.mxu1 }
 0x356   : > { %v768_v19 = vpop.f32.mrf.mxu0 }
 0x357   : > { %v772_v20 = vadd.f32 %v768_v19, %v691_v18 }
 0x35e   : > { %v770_v21 = vpop.f32.mrf.mxu0 }
 0x362   : > { %v798_v22 = vpop.xlane.xlu1 %797 }
 0x363   : > { %v799_v23 = vsub.f32 %v792_v13, %v798_v22 }
 0x365   : > { %v800_v24 = vmul.f32 1.442695, %v799_v23 }
 0x366   : > { %v870_v25 = vpop.f32.mrf.mxu0 }
 0x367   : > { %1282 = vpow2.f32 %v800_v24  ;;  %v874_v27 = vsel %vm618_vm1, %v870_v25, -inf }
 0x368   : > { %875 = vmax.xlane.f32.xlu0 %v874_v27 }
 0x36d   : > { %v1283_v28 = vpop.eup %1282 }
 0x36e   : > { %v872_v29 = vpop.f32.mrf.mxu0  ;;  %v802_v30 = vsel %vm618_vm1, %v1283_v28, 0.0  ;;  %v806_v38 = vpack.c.bf16 %v1283_v28, %v1283_v28 }
 0x36f   : > { %803 = vadd.xlane.f32.xlu2 %v802_v30 }
 0x37c   : > { %807 = vrot.lane.b32.xlu0 %v1800_v26, %s1577_s22  ;;  %v913_v26 = vsel %vm652_vm2, %v908_v39, 0 }
 0x3db   : > { %v876_v4 = vpop.xlane.xlu0 %875 }
 0x3dc   : > { %v877_v31 = vsub.f32 %v870_v25, %v876_v4 }
 0x3de   : > { %v878_v32 = vmul.f32 1.442695, %v877_v31 }
 0x3e0   : > { %1284 = vpow2.f32 %v878_v32 }
 0x3e2   : > { %v804_v47 = vpop.xlane.xlu2 %803 }
 0x3e6   : > { %v1285_v33 = vpop.eup %1284 }
 0x3e7   : > { %v884_v34 = vpack.c.bf16 %v1285_v33, %v1285_v33  ;;  %v880_v35 = vsel %vm618_vm1, %v1285_v33, 0.0 }
 0x3e8   : > { %881 = vadd.xlane.f32.xlu0 %v880_v35 }
 0x3e9   : > { %1145 = vmatmul.msk.bf16.vlgmr.msrb.gmra.mxu1 %vm618_vm1, %v884_v34 }
 0x3ee   : > { %v808_v36 = vpop.permute.xlu0 %807 }
 0x3ef   : > { %v813_v37 = vsel %vm652_vm2, %v808_v36, 0 }
 0x3f0   : > { %822 = vmatpush.bf16.msra.mxu2 %v813_v37 }
 0x3f3   : > { %1142 = vmatmul.msk.bf16.vlgmr.msra.gmra.mxu2 %vm618_vm1, %v806_v38 }
 0x3f4   : > { %922 = vmatpush.bf16.msrb.mxu2 %v913_v26 }
 0x45b   : > { %v882_v42 = vpop.xlane.xlu0 %881 }
 0x45c   : > { %1286 = vrcp.f32 %v882_v42 }
 0x45d   : > { %1288 = vrcp.f32 %v804_v47 }
 0x462   : > { %v1287_v43 = vpop.eup %1286 }
 0x463   : > { %v1289_v49 = vpop.eup %1288 }
 0x466   : > { %v902_v44 = vpop.f32.mrf.mxu1 }
 0x467   : > { %v906_v45 = vmul.f32 %v1287_v43, %v902_v44 }
 0x469   : > { %v907_v46 = vpack.c.bf16 %v906_v45, %v906_v45 }
 0x46b   : > { %1146 = vmatmul.msk.bf16.vlgmr.msrb.gmra.mxu2 %vm618_vm1, %v907_v46 }
 0x46e   : > { %v904_v48 = vpop.f32.mrf.mxu1 }
 0x476   : > { %v824_v50 = vpop.f32.mrf.mxu2 }
 0x477   : > { %v828_v51 = vmul.f32 %v1289_v49, %v824_v50 }
 0x479   : > { %v829_v52 = vpack.c.bf16 %v828_v51, %v828_v51 }
 0x47b   : > { %1143 = vmatmul.msk.bf16.vlgmr.msra.gmra.mxu3 %vm618_vm1, %v829_v52 }
 0x47e   : > { %v826_v53 = vpop.f32.mrf.mxu2 }
 0x4ee   : > { %v924_v54 = vpop.f32.mrf.mxu2 }
 0x4f6   : > { %v926_v55 = vpop.f32.mrf.mxu2 }
 0x4fe   : > { %v846_v56 = vpop.f32.mrf.mxu3 }
 0x4ff   : > { %v850_v57 = vadd.f32 %v846_v56, %v772_v20 }
 0x501   : > { %v928_v58 = vadd.f32 %v924_v54, %v850_v57 }
 0x503   : > { %929 = vst.msk [vmem:[%s498_s15] sm:$0xff] %vm524_vm0, %v928_v58 }
 0x504   : > { %1497 = shalt.err (!%p1494_p13)
}
 0x505   : > { %1177 = dma.vmem_to_hbm [thread:$0]  (%p1726_p2), %s945_s17, 128, %s947_s23, %s931_s19  }
 0x506   : > { %v848_v59 = vpop.f32.mrf.mxu3 }
 0x507 PF: > { %s1922_s8 = sld [smem:[#allocation20_spill]]  ;;  %p1200_p0 = pnand %p1095_p6, %p1733_p5 }
 0x509   : > { %p1201_p4 = pneg %p1200_p0 }
 0x50d   : > { %s958_s22 = sand.u32 1, %s1922_s8  }
 0x50e   : > { %s959_s25 = scalar_lea.sflag [#allocation4], %s958_s22 }
 0x50f   : > { %1543 = dma.done.wait (%p1201_p4), %s959_s25, 128  }
 0x510   : > { %1545 = vsyncadd (%p1201_p4), %s959_s25, 4294967168  ;;  %s31_s18 = sadd.s32 1, %s1568_s18   ;;  %s1924_s21 = sld [smem:[#allocation21_spill]] }
 0x511   : > { %p28_p7 = scmp.ge.s32.totalorder %s31_s18, 4   ;;  %s1925_s15 = sld [smem:[#allocation25_spill]] }
 0x512   : > { %s1926_s16 = sld [smem:[#allocation22_spill]]  ;;  %s1928_s13 = smov %s1552_s14 }
 0x513   : > { %s1927_s17 = sld [smem:[#allocation23_spill]]  ;;  %30 = sbr.rel (!%p28_p7) target bundleno = 15 (0xf), region = 134 }
 0x516   : > { %s1929_s14 = smov %s1924_s21 }
 0x518   :  { %965 = vsyncpa [#allocation3], 1 }
 0x519   :  { %967 = vsyncpa [#allocation3 + $0x1], 1 }
 0x51a   :  { %968 = vsyncpa [#allocation6], 1 }
 0x51b   :  { %970 = vsyncpa [#allocation6 + $0x1], 1 }
 0x51c   :  { %971 = vsyncpa [#allocation9], 1 }
 0x51d   :  { %972 = vsyncpa [#allocation12], 1 }
 0x51e   :  { %973 = vsyncpa [#allocation4], 1 }
 0x51f   :  { %975 = vsyncpa [#allocation4 + $0x1], 1 }

</bundles_post_ra>
